<compile_context>
chip_gen: v5e
topology: v5e:2x2
jax: 0.10.0
libtpu: 0.0.40
codegen_flags: <defaults>
</compile_context>

<pallas_src>
import functools

import jax
import jax.numpy as jnp
from jax.experimental import pallas as pl
from jax.experimental.pallas import tpu as pltpu


def _round_up(v, m):
    return ((v + m - 1) // m) * m


def _ffn_kernel(x_ref, w1_ref, b1_ref, w2_ref, b2_ref, o_ref, acc_ref):
    """One (row-tile i, pfdim-slab k) grid step of fc2(relu(fc1(x)))."""
    k = pl.program_id(1)

    @pl.when(k == 0)
    def _():
        acc_ref[...] = jnp.zeros_like(acc_ref)

    # fc_1 slab: (tm, nhid_p) @ (nhid_p, tk) -> (tm, tk), f32 MXU accumulate.
    h = jnp.dot(x_ref[...], w1_ref[...], preferred_element_type=jnp.float32)
    h = jnp.maximum(h + b1_ref[...], 0.0)  # bias + ReLU (elementwise per slab)
    # dropout: identity in eval mode.
    # fc_2 partial sum over pfdim slabs: (tm, tk) @ (tk, nhid_p).
    acc_ref[...] += jnp.dot(h.astype(w2_ref.dtype), w2_ref[...],
                            preferred_element_type=jnp.float32)

    @pl.when(k == pl.num_programs(1) - 1)
    def _():
        o_ref[...] = (acc_ref[...] + b2_ref[...]).astype(o_ref.dtype)


def prepare_ffn_params(w1, b1, w2, b2, param_dtype=None):
    """One-time parameter prep (hoisted out of the per-call forward path):
       - transpose nn.Linear weights to (in, out) so the kernel does x @ W,
       - zero-pad feature dims to multiples of 128 (lane-dense layout),
       - optional cast (e.g. jnp.bfloat16) to halve weight VMEM/HBM traffic.
    """
    pfdim, nhid = w1.shape
    nhid_p = _round_up(nhid, 128)
    pfdim_p = _round_up(pfdim, 128)
    dt = param_dtype if param_dtype is not None else w1.dtype
    w1t = jnp.zeros((nhid_p, pfdim_p), dt).at[:nhid, :pfdim].set(w1.T.astype(dt))
    w2t = jnp.zeros((pfdim_p, nhid_p), dt).at[:pfdim, :nhid].set(w2.T.astype(dt))
    b1p = jnp.zeros((1, pfdim_p), dt).at[0, :pfdim].set(b1.astype(dt))
    b2p = jnp.zeros((1, nhid_p), dt).at[0, :nhid].set(b2.astype(dt))
    return w1t, b1p, w2t, b2p


@functools.partial(jax.jit,
                   static_argnames=("tm", "tk", "single_buffer_invariants"))
def positionwise_ffn(x, w1t, b1p, w2t, b2p, *, tm=None, tk=None,
                     single_buffer_invariants=True):
    """x: [batch, seq, nhid]; params come from prepare_ffn_params()."""
    batch, seq, nhid = x.shape
    nhid_p, pfdim_p = w1t.shape
    M = batch * seq

    # Row tile: fixed size (multiple of 8 sublanes, <=256) so the grid has many
    # steps -> pipelined x/out DMA and megacore sharding; 256 fills the v6e/v7x MXU.
    if tm is None:
        tm = min(256, _round_up(M, 8))
    M_p = _round_up(M, tm)
    n_row_tiles = M_p // tm

    # pfdim slab: keep both weights fully resident when small; otherwise stream
    # slabs along a reduction axis with an f32 accumulator (bounds VMEM on v7x).
    if tk is None:
        if pfdim_p <= 1024:
            tk = pfdim_p
        else:
            tk = max(d for d in (1024, 512, 256, 128) if pfdim_p % d == 0)
    nk = pfdim_p // tk

    x2d = x.reshape(M, nhid)
    if (M_p != M) or (nhid_p != nhid):
        x2d = jnp.pad(x2d, ((0, M_p - M), (0, nhid_p - nhid)))

    # Loop-invariant operands don't need a second pipeline buffer.
    use_sb = bool(single_buffer_invariants)
    w_mode = pl.Buffered(1) if (use_sb and nk == 1) else None  # const iff 1 slab
    b2_mode = pl.Buffered(1) if use_sb else None               # const over grid

    xsize = jnp.dtype(x.dtype).itemsize
    wsize = jnp.dtype(w1t.dtype).itemsize
    n_wbuf = 1 if (use_sb and nk == 1) else 2
    vmem_bytes = (
        n_wbuf * (nhid_p * tk + tk * nhid_p + tk) * wsize  # W1 slab, W2 slab, b1 slab
        + nhid_p * wsize                                   # b2
        + 2 * tm * nhid_p * xsize                          # x tile (double-buffered)
        + 2 * tm * nhid_p * xsize                          # out tile (double-buffered)
        + tm * nhid_p * 4                                  # f32 accumulator scratch
        + tm * tk * 4                                      # h intermediate
    )
    vmem_limit = min(max(int(vmem_bytes * 1.5) + (2 << 20), 16 << 20), 64 << 20)

    flops = 4 * M_p * nhid_p * pfdim_p  # two matmuls, 2*M*K*N each
    bytes_accessed = (2 * M_p * nhid_p * xsize
                      + (2 * nhid_p * pfdim_p + pfdim_p + nhid_p) * wsize)

    out2d = pl.pallas_call(
        _ffn_kernel,
        out_shape=jax.ShapeDtypeStruct((M_p, nhid_p), x.dtype),
        grid_spec=pltpu.PrefetchScalarGridSpec(
            num_scalar_prefetch=0,
            grid=(n_row_tiles, nk),                 # reduction (pfdim slabs) last
            in_specs=[
                pl.BlockSpec((tm, nhid_p), lambda i, k: (i, 0)),   # x rows
                pl.BlockSpec((nhid_p, tk), lambda i, k: (0, k),
                             pipeline_mode=w_mode),                # W1^T slab
                pl.BlockSpec((1, tk), lambda i, k: (0, k),
                             pipeline_mode=w_mode),                # b1 slab
                pl.BlockSpec((tk, nhid_p), lambda i, k: (k, 0),
                             pipeline_mode=w_mode),                # W2^T slab
                pl.BlockSpec((1, nhid_p), lambda i, k: (0, 0),
                             pipeline_mode=b2_mode),               # b2
            ],
            out_specs=pl.BlockSpec((tm, nhid_p), lambda i, k: (i, 0)),
            scratch_shapes=[pltpu.VMEM((tm, nhid_p), jnp.float32)],
        ),
        compiler_params=pltpu.CompilerParams(
            dimension_semantics=("parallel", "arbitrary"),
            vmem_limit_bytes=vmem_limit),
        cost_estimate=pl.CostEstimate(flops=flops, transcendentals=0,
                                      bytes_accessed=bytes_accessed),
    )(x2d, w1t, b1p, w2t, b2p)

    return out2d[:M, :nhid].reshape(batch, seq, nhid)


if __name__ == "__main__":
    # --- Test 1: module-consistent small shapes (same as the PyTorch spec) ---
    batch, seq, nhid, pfdim = 2, 8, 32, 64
    dropout_p = 0.1  # identity at inference

    key = jax.random.PRNGKey(0)
    kx, kw1, kb1, kw2, kb2 = jax.random.split(key, 5)

    x = jax.random.normal(kx, (batch, seq, nhid), dtype=jnp.float32)
    w1 = jax.random.normal(kw1, (pfdim, nhid), dtype=jnp.float32) * 0.1   # fc_1.weight
    b1 = jax.random.normal(kb1, (pfdim,), dtype=jnp.float32) * 0.1        # fc_1.bias
    w2 = jax.random.normal(kw2, (nhid, pfdim), dtype=jnp.float32) * 0.1   # fc_2.weight
    b2 = jax.random.normal(kb2, (nhid,), dtype=jnp.float32) * 0.1         # fc_2.bias

    # One-time prep (transpose + pad to 128-multiples), hoisted out of the call path.
    params = prepare_ffn_params(w1, b1, w2, b2)

    try:
        out = jax.block_until_ready(positionwise_ffn(x, *params))
        sb_ok = True
    except Exception:
        # Fallback if this JAX build rejects single-buffering of invariant operands.
        sb_ok = False
        out = jax.block_until_ready(
            positionwise_ffn(x, *params, single_buffer_invariants=False))

    ref = jnp.maximum(x @ w1.T + b1, 0.0) @ w2.T + b2
    assert out.shape == (batch, seq, nhid)
    assert jnp.allclose(out, ref, atol=1e-4, rtol=1e-4)

    # --- Test 2: exercise the multi-row-tile grid + pfdim-slab accumulator path ---
    batch2, seq2, nhid2, pfdim2 = 2, 128, 128, 256
    key2 = jax.random.PRNGKey(1)
    kx2, ka, kb, kc, kd = jax.random.split(key2, 5)
    x2 = jax.random.normal(kx2, (batch2, seq2, nhid2), dtype=jnp.float32)
    w1b = jax.random.normal(ka, (pfdim2, nhid2), dtype=jnp.float32) * 0.05
    b1b = jax.random.normal(kb, (pfdim2,), dtype=jnp.float32) * 0.05
    w2b = jax.random.normal(kc, (nhid2, pfdim2), dtype=jnp.float32) * 0.05
    b2b = jax.random.normal(kd, (nhid2,), dtype=jnp.float32) * 0.05
    params2 = prepare_ffn_params(w1b, b1b, w2b, b2b)

    out2 = positionwise_ffn(x2, *params2, tm=128, tk=128,
                            single_buffer_invariants=sb_ok)
    out2 = jax.block_until_ready(out2)
    ref2 = jnp.maximum(x2 @ w1b.T + b1b, 0.0) @ w2b.T + b2b
    assert out2.shape == (batch2, seq2, nhid2)
    assert jnp.allclose(out2, ref2, atol=2e-3, rtol=2e-3)

    print("KERNEL_OK")
</pallas_src>

<mosaic_0001>
module attributes {stable_mosaic.version = 11 : i64} {
  func.func @_ffn_kernel(%arg0: i32, %arg1: i32, %arg2: memref<16x128xf32, #tpu.memory_space<vmem>>, %arg3: memref<128x128xf32, #tpu.memory_space<vmem>>, %arg4: memref<1x128xf32, #tpu.memory_space<vmem>>, %arg5: memref<128x128xf32, #tpu.memory_space<vmem>>, %arg6: memref<1x128xf32, #tpu.memory_space<vmem>>, %arg7: memref<16x128xf32, #tpu.memory_space<vmem>>, %arg8: memref<16x128xf32, #tpu.memory_space<vmem>>) attributes {dimension_semantics = [#tpu.dimension_semantics<parallel>, #tpu.dimension_semantics<arbitrary>], iteration_bounds = array<i64: 1, 1>, scalar_prefetch = 0 : i64, scratch_operands = 1 : i64, tpu.core_type = #tpu.core_type<tc>, window_params = [{transform_indices = @transform_0, window_bounds = array<i64: 16, 128>}, {pipeline_mode = #tpu.pipeline_mode<synchronous>, transform_indices = @transform_1, window_bounds = array<i64: 128, 128>}, {pipeline_mode = #tpu.pipeline_mode<synchronous>, transform_indices = @transform_2, window_bounds = array<i64: 1, 128>}, {pipeline_mode = #tpu.pipeline_mode<synchronous>, transform_indices = @transform_3, window_bounds = array<i64: 128, 128>}, {pipeline_mode = #tpu.pipeline_mode<synchronous>, transform_indices = @transform_4, window_bounds = array<i64: 1, 128>}, {transform_indices = @transform_5, window_bounds = array<i64: 16, 128>}]} {
    %c0_i32 = arith.constant 0 : i32
    %0 = arith.cmpi eq, %arg1, %c0_i32 : i32
    %1 = arith.extui %0 : i1 to i32
    %c0_i32_0 = arith.constant 0 : i32
    %2 = arith.cmpi ne, %1, %c0_i32_0 : i32
    scf.if %2 {
      %cst_16 = arith.constant 0.000000e+00 : f32
      %19 = vector.broadcast %cst_16 : f32 to vector<16x128xf32>
      %c0_17 = arith.constant 0 : index
      %c0_18 = arith.constant 0 : index
      %20 = vector.load %arg8[%c0_17, %c0_18] : memref<16x128xf32, #tpu.memory_space<vmem>>, vector<16x128xf32>
      tpu.vector_store %arg8[%c0_17, %c0_18], %19 {strides = array<i32>} : memref<16x128xf32, #tpu.memory_space<vmem>>, vector<16x128xf32>,
    } else {
    }
    %c0 = arith.constant 0 : index
    %c0_1 = arith.constant 0 : index
    %3 = vector.load %arg2[%c0, %c0_1] : memref<16x128xf32, #tpu.memory_space<vmem>>, vector<16x128xf32>
    %c0_2 = arith.constant 0 : index
    %c0_3 = arith.constant 0 : index
    %4 = vector.load %arg3[%c0_2, %c0_3] : memref<128x128xf32, #tpu.memory_space<vmem>>, vector<128x128xf32>
    %cst = arith.constant dense<0.000000e+00> : vector<16x128xf32>
    %5 = tpu.matmul %3, %4, %cst {dimension_numbers = #tpu.dot_dimension_numbers<[1], [0], [0], [1], [0, 0, 1, 1], [], []>} : vector<16x128xf32>, vector<128x128xf32>, vector<16x128xf32> -> vector<16x128xf32>
    %c0_4 = arith.constant 0 : index
    %c0_5 = arith.constant 0 : index
    %6 = vector.load %arg4[%c0_4, %c0_5] : memref<1x128xf32, #tpu.memory_space<vmem>>, vector<1x128xf32>
    %7 = vector.broadcast %6 : vector<1x128xf32> to vector<16x128xf32>
    %8 = arith.addf %5, %7 : vector<16x128xf32>
    %cst_6 = arith.constant 0.000000e+00 : f32
    %9 = vector.broadcast %cst_6 : f32 to vector<16x128xf32>
    %10 = arith.maximumf %8, %9 : vector<16x128xf32>
    %c0_7 = arith.constant 0 : index
    %c0_8 = arith.constant 0 : index
    %11 = vector.load %arg8[%c0_7, %c0_8] : memref<16x128xf32, #tpu.memory_space<vmem>>, vector<16x128xf32>
    %c0_9 = arith.constant 0 : index
    %c0_10 = arith.constant 0 : index
    %12 = vector.load %arg5[%c0_9, %c0_10] : memref<128x128xf32, #tpu.memory_space<vmem>>, vector<128x128xf32>
    %cst_11 = arith.constant dense<0.000000e+00> : vector<16x128xf32>
    %13 = tpu.matmul %10, %12, %cst_11 {dimension_numbers = #tpu.dot_dimension_numbers<[1], [0], [0], [1], [0, 0, 1, 1], [], []>} : vector<16x128xf32>, vector<128x128xf32>, vector<16x128xf32> -> vector<16x128xf32>
    %14 = arith.addf %11, %13 : vector<16x128xf32>
    %c0_12 = arith.constant 0 : index
    %c0_13 = arith.constant 0 : index
    %15 = vector.load %arg8[%c0_12, %c0_13] : memref<16x128xf32, #tpu.memory_space<vmem>>, vector<16x128xf32>
    tpu.vector_store %arg8[%c0_12, %c0_13], %14 {strides = array<i32>} : memref<16x128xf32, #tpu.memory_space<vmem>>, vector<16x128xf32>,
    %c0_i32_14 = arith.constant 0 : i32
    %16 = arith.cmpi eq, %arg1, %c0_i32_14 : i32
    %17 = arith.extui %16 : i1 to i32
    %c0_i32_15 = arith.constant 0 : i32
    %18 = arith.cmpi ne, %17, %c0_i32_15 : i32
    scf.if %18 {
      %c0_16 = arith.constant 0 : index
      %c0_17 = arith.constant 0 : index
      %19 = vector.load %arg8[%c0_16, %c0_17] : memref<16x128xf32, #tpu.memory_space<vmem>>, vector<16x128xf32>
      %c0_18 = arith.constant 0 : index
      %c0_19 = arith.constant 0 : index
      %20 = vector.load %arg6[%c0_18, %c0_19] : memref<1x128xf32, #tpu.memory_space<vmem>>, vector<1x128xf32>
      %21 = vector.broadcast %20 : vector<1x128xf32> to vector<16x128xf32>
      %22 = arith.addf %19, %21 : vector<16x128xf32>
      %c0_20 = arith.constant 0 : index
      %c0_21 = arith.constant 0 : index
      %23 = vector.load %arg7[%c0_20, %c0_21] : memref<16x128xf32, #tpu.memory_space<vmem>>, vector<16x128xf32>
      tpu.vector_store %arg7[%c0_20, %c0_21], %22 {strides = array<i32>} : memref<16x128xf32, #tpu.memory_space<vmem>>, vector<16x128xf32>,
    } else {
    }
    return
  }
  func.func @transform_0(%arg0: i32, %arg1: i32) -> (i32, i32) {
    %c0_i32 = arith.constant 0 : i32
    %c0_i32_0 = arith.constant 0 : i32
    return %arg0, %c0_i32 : i32, i32
  }
  func.func @transform_1(%arg0: i32, %arg1: i32) -> (i32, i32) {
    %c0_i32 = arith.constant 0 : i32
    %c0_i32_0 = arith.constant 0 : i32
    return %c0_i32, %arg1 : i32, i32
  }
  func.func @transform_2(%arg0: i32, %arg1: i32) -> (i32, i32) {
    %c0_i32 = arith.constant 0 : i32
    %c0_i32_0 = arith.constant 0 : i32
    return %c0_i32, %arg1 : i32, i32
  }
  func.func @transform_3(%arg0: i32, %arg1: i32) -> (i32, i32) {
    %c0_i32 = arith.constant 0 : i32
    %c0_i32_0 = arith.constant 0 : i32
    return %arg1, %c0_i32 : i32, i32
  }
  func.func @transform_4(%arg0: i32, %arg1: i32) -> (i32, i32) {
    %c0_i32 = arith.constant 0 : i32
    %c0_i32_0 = arith.constant 0 : i32
    %c0_i32_1 = arith.constant 0 : i32
    return %c0_i32, %c0_i32_0 : i32, i32
  }
  func.func @transform_5(%arg0: i32, %arg1: i32) -> (i32, i32) {
    %c0_i32 = arith.constant 0 : i32
    %c0_i32_0 = arith.constant 0 : i32
    return %arg0, %c0_i32 : i32, i32
  }
}

module attributes {stable_mosaic.version = 11 : i64} {
  func.func @_ffn_kernel(%arg0: i32, %arg1: i32, %arg2: memref<16x128xf32, #tpu.memory_space<vmem>>, %arg3: memref<128x128xf32, #tpu.memory_space<vmem>>, %arg4: memref<1x128xf32, #tpu.memory_space<vmem>>, %arg5: memref<128x128xf32, #tpu.memory_space<vmem>>, %arg6: memref<1x128xf32, #tpu.memory_space<vmem>>, %arg7: memref<16x128xf32, #tpu.memory_space<vmem>>, %arg8: memref<16x128xf32, #tpu.memory_space<vmem>>) attributes {dimension_semantics = [#tpu.dimension_semantics<parallel>, #tpu.dimension_semantics<arbitrary>], iteration_bounds = array<i64: 1, 1>, scalar_prefetch = 0 : i64, scratch_operands = 1 : i64, tpu.core_type = #tpu.core_type<tc>, window_params = [{transform_indices = @transform_0, window_bounds = array<i64: 16, 128>}, {transform_indices = @transform_1, window_bounds = array<i64: 128, 128>}, {transform_indices = @transform_2, window_bounds = array<i64: 1, 128>}, {transform_indices = @transform_3, window_bounds = array<i64: 128, 128>}, {pipeline_mode = #tpu.pipeline_mode<synchronous>, transform_indices = @transform_4, window_bounds = array<i64: 1, 128>}, {transform_indices = @transform_5, window_bounds = array<i64: 16, 128>}]} {
    %c0_i32 = arith.constant 0 : i32
    %0 = arith.cmpi eq, %arg1, %c0_i32 : i32
    %1 = arith.extui %0 : i1 to i32
    %c0_i32_0 = arith.constant 0 : i32
    %2 = arith.cmpi ne, %1, %c0_i32_0 : i32
    scf.if %2 {
      %cst_16 = arith.constant 0.000000e+00 : f32
      %19 = vector.broadcast %cst_16 : f32 to vector<16x128xf32>
      %c0_17 = arith.constant 0 : index
      %c0_18 = arith.constant 0 : index
      %20 = vector.load %arg8[%c0_17, %c0_18] : memref<16x128xf32, #tpu.memory_space<vmem>>, vector<16x128xf32>
      tpu.vector_store %arg8[%c0_17, %c0_18], %19 {strides = array<i32>} : memref<16x128xf32, #tpu.memory_space<vmem>>, vector<16x128xf32>,
    } else {
    }
    %c0 = arith.constant 0 : index
    %c0_1 = arith.constant 0 : index
    %3 = vector.load %arg2[%c0, %c0_1] : memref<16x128xf32, #tpu.memory_space<vmem>>, vector<16x128xf32>
    %c0_2 = arith.constant 0 : index
    %c0_3 = arith.constant 0 : index
    %4 = vector.load %arg3[%c0_2, %c0_3] : memref<128x128xf32, #tpu.memory_space<vmem>>, vector<128x128xf32>
    %cst = arith.constant dense<0.000000e+00> : vector<16x128xf32>
    %5 = tpu.matmul %3, %4, %cst {dimension_numbers = #tpu.dot_dimension_numbers<[1], [0], [0], [1], [0, 0, 1, 1], [], []>} : vector<16x128xf32>, vector<128x128xf32>, vector<16x128xf32> -> vector<16x128xf32>
    %c0_4 = arith.constant 0 : index
    %c0_5 = arith.constant 0 : index
    %6 = vector.load %arg4[%c0_4, %c0_5] : memref<1x128xf32, #tpu.memory_space<vmem>>, vector<1x128xf32>
    %7 = vector.broadcast %6 : vector<1x128xf32> to vector<16x128xf32>
    %8 = arith.addf %5, %7 : vector<16x128xf32>
    %cst_6 = arith.constant 0.000000e+00 : f32
    %9 = vector.broadcast %cst_6 : f32 to vector<16x128xf32>
    %10 = arith.maximumf %8, %9 : vector<16x128xf32>
    %c0_7 = arith.constant 0 : index
    %c0_8 = arith.constant 0 : index
    %11 = vector.load %arg8[%c0_7, %c0_8] : memref<16x128xf32, #tpu.memory_space<vmem>>, vector<16x128xf32>
    %c0_9 = arith.constant 0 : index
    %c0_10 = arith.constant 0 : index
    %12 = vector.load %arg5[%c0_9, %c0_10] : memref<128x128xf32, #tpu.memory_space<vmem>>, vector<128x128xf32>
    %cst_11 = arith.constant dense<0.000000e+00> : vector<16x128xf32>
    %13 = tpu.matmul %10, %12, %cst_11 {dimension_numbers = #tpu.dot_dimension_numbers<[1], [0], [0], [1], [0, 0, 1, 1], [], []>} : vector<16x128xf32>, vector<128x128xf32>, vector<16x128xf32> -> vector<16x128xf32>
    %14 = arith.addf %11, %13 : vector<16x128xf32>
    %c0_12 = arith.constant 0 : index
    %c0_13 = arith.constant 0 : index
    %15 = vector.load %arg8[%c0_12, %c0_13] : memref<16x128xf32, #tpu.memory_space<vmem>>, vector<16x128xf32>
    tpu.vector_store %arg8[%c0_12, %c0_13], %14 {strides = array<i32>} : memref<16x128xf32, #tpu.memory_space<vmem>>, vector<16x128xf32>,
    %c0_i32_14 = arith.constant 0 : i32
    %16 = arith.cmpi eq, %arg1, %c0_i32_14 : i32
    %17 = arith.extui %16 : i1 to i32
    %c0_i32_15 = arith.constant 0 : i32
    %18 = arith.cmpi ne, %17, %c0_i32_15 : i32
    scf.if %18 {
      %c0_16 = arith.constant 0 : index
      %c0_17 = arith.constant 0 : index
      %19 = vector.load %arg8[%c0_16, %c0_17] : memref<16x128xf32, #tpu.memory_space<vmem>>, vector<16x128xf32>
      %c0_18 = arith.constant 0 : index
      %c0_19 = arith.constant 0 : index
      %20 = vector.load %arg6[%c0_18, %c0_19] : memref<1x128xf32, #tpu.memory_space<vmem>>, vector<1x128xf32>
      %21 = vector.broadcast %20 : vector<1x128xf32> to vector<16x128xf32>
      %22 = arith.addf %19, %21 : vector<16x128xf32>
      %c0_20 = arith.constant 0 : index
      %c0_21 = arith.constant 0 : index
      %23 = vector.load %arg7[%c0_20, %c0_21] : memref<16x128xf32, #tpu.memory_space<vmem>>, vector<16x128xf32>
      tpu.vector_store %arg7[%c0_20, %c0_21], %22 {strides = array<i32>} : memref<16x128xf32, #tpu.memory_space<vmem>>, vector<16x128xf32>,
    } else {
    }
    return
  }
  func.func @transform_0(%arg0: i32, %arg1: i32) -> (i32, i32) {
    %c0_i32 = arith.constant 0 : i32
    %c0_i32_0 = arith.constant 0 : i32
    return %arg0, %c0_i32 : i32, i32
  }
  func.func @transform_1(%arg0: i32, %arg1: i32) -> (i32, i32) {
    %c0_i32 = arith.constant 0 : i32
    %c0_i32_0 = arith.constant 0 : i32
    return %c0_i32, %arg1 : i32, i32
  }
  func.func @transform_2(%arg0: i32, %arg1: i32) -> (i32, i32) {
    %c0_i32 = arith.constant 0 : i32
    %c0_i32_0 = arith.constant 0 : i32
    return %c0_i32, %arg1 : i32, i32
  }
  func.func @transform_3(%arg0: i32, %arg1: i32) -> (i32, i32) {
    %c0_i32 = arith.constant 0 : i32
    %c0_i32_0 = arith.constant 0 : i32
    return %arg1, %c0_i32 : i32, i32
  }
  func.func @transform_4(%arg0: i32, %arg1: i32) -> (i32, i32) {
    %c0_i32 = arith.constant 0 : i32
    %c0_i32_0 = arith.constant 0 : i32
    %c0_i32_1 = arith.constant 0 : i32
    return %c0_i32, %c0_i32_0 : i32, i32
  }
  func.func @transform_5(%arg0: i32, %arg1: i32) -> (i32, i32) {
    %c0_i32 = arith.constant 0 : i32
    %c0_i32_0 = arith.constant 0 : i32
    return %arg0, %c0_i32 : i32, i32
  }
}

</mosaic_0001>

<bundles_post_ra>
// kernel: positionwise_ffn.1
= control target key start
LH: loop header
LB: loop body
LE: loop exit
PB: predicated region body
PF: predicated region fallthrough
CT: control target
= control target key end

     0   :  { %10 = vsyncpa [#allocation4], 0  ;;  %s317_s0 = inlined_call_operand.vmem [shape: f32[16,128], index: 0, kind: input, shape index: {}]   ;;  %s318_s1 = inlined_call_operand.hbm [shape: f32[128,128], index: 1, kind: input, shape index: {}]   ;;  %s319_s2 = inlined_call_operand.vmem [shape: f32[1,128], index: 2, kind: input, shape index: {}]   ;;  %s320_s3 = inlined_call_operand.hbm [shape: f32[128,128], index: 3, kind: input, shape index: {}]   ;;  %s321_s4 = inlined_call_operand.vmem [shape: f32[1,128], index: 4, kind: input, shape index: {}]   ;;  %s322_s5 = inlined_call_operand.vmem [shape: f32[16,128], index: 5, kind: output, shape index: {}]  }
   0x1   :  { %s18_s20 = sshll.u32 %s318_s1, 4  ;;  %s19_s20 = int_to_ptr.hbm [resolvable:$true] %s18_s20 }
   0x2   :  { %11 = vsyncpa [#allocation6], 0  ;;  %s259_s21 = smov [#allocation3]   ;;  %s33_s25 = sshll.u32 %s320_s3, 4  ;;  %s34_s25 = int_to_ptr.hbm [resolvable:$true] %s33_s25 }
   0x3   :  { %s20_s22 = sshll.u32 %s259_s21, 4  ;;  %s260_s26 = smov 128   ;;  %s21_s22 = int_to_ptr.vmem [resolvable:$true] %s20_s22 }
   0x4   :  { %s261_s27 = smov 8   ;;  %s262_s28 = smov [#allocation5]  }
   0x5   :  { %26 = dma.hbm_to_vmem [thread:$0]  %s19_s20, 2048, %s21_s22, [#allocation4], %s260_s26, %s260_s26, %s261_s27  }
   0x6   :  { %s35_s29 = sshll.u32 %s262_s28, 4  ;;  %s36_s29 = int_to_ptr.vmem [resolvable:$true] %s35_s29 }
   0x7   :  { %41 = dma.hbm_to_vmem [thread:$0]  %s34_s25, 2048, %s36_s29, [#allocation6], %s260_s26, %s260_s26, %s261_s27  }
   0x8   :  { %255 = dma.done.wait [#allocation4], 2048  }
   0x9   :  { %256 = vsyncadd [#allocation4], 4294965248 }
   0xa   :  { %257 = dma.done.wait [#allocation6], 2048  }
   0xb   :  { %258 = vsyncadd [#allocation6], 4294965248  ;;  %v75_v0 = vld [vmem:[#allocation3 + $0x78] sm:$0xff]  ;;  %v74_v1 = vld [vmem:[#allocation3 + $0x70] sm:$0xff] }
   0xc   :  { %169 = vmatpush.msra.mxu2 %v75_v0  ;;  %80 = vmatpush.msra.mxu0 %v75_v0  ;;  %v73_v2 = vld [vmem:[#allocation3 + $0x68] sm:$0xff]  ;;  %v72_v3 = vld [vmem:[#allocation3 + $0x60] sm:$0xff]  ;;  %v71_v4 = vld [vmem:[#allocation3 + $0x58] sm:$0xff] }
   0xd   :  { %v122_v5 = vld [vmem:[#allocation5 + $0x78] sm:$0xff]  ;;  %v121_v6 = vld [vmem:[#allocation5 + $0x70] sm:$0xff]  ;;  %v120_v8 = vld [vmem:[#allocation5 + $0x68] sm:$0xff] }
   0xe   :  { %170 = vmatpush.msra.mxu2 %v74_v1  ;;  %81 = vmatpush.msra.mxu0 %v74_v1  ;;  %v70_v7 = vld [vmem:[#allocation3 + $0x50] sm:$0xff]  ;;  %v69_v9 = vld [vmem:[#allocation3 + $0x48] sm:$0xff]  ;;  %v119_v10 = vld [vmem:[#allocation5 + $0x60] sm:$0xff] }
   0xf   :  { %185 = vmatpush.msra.mxu3 %v122_v5  ;;  %123 = vmatpush.msra.mxu1 %v122_v5  ;;  %v68_v11 = vld [vmem:[#allocation3 + $0x40] sm:$0xff]  ;;  %v118_v12 = vld [vmem:[#allocation5 + $0x58] sm:$0xff]  ;;  %v117_v14 = vld [vmem:[#allocation5 + $0x50] sm:$0xff] }
  0x10   :  { %171 = vmatpush.msra.mxu2 %v73_v2  ;;  %82 = vmatpush.msra.mxu0 %v73_v2  ;;  %v67_v13 = vld [vmem:[#allocation3 + $0x38] sm:$0xff]  ;;  %v66_v15 = vld [vmem:[#allocation3 + $0x30] sm:$0xff]  ;;  %v116_v16 = vld [vmem:[#allocation5 + $0x48] sm:$0xff] }
  0x11   :  { %186 = vmatpush.msra.mxu3 %v121_v6  ;;  %124 = vmatpush.msra.mxu1 %v121_v6  ;;  %v65_v17 = vld [vmem:[#allocation3 + $0x28] sm:$0xff]  ;;  %v115_v18 = vld [vmem:[#allocation5 + $0x40] sm:$0xff]  ;;  %v114_v20 = vld [vmem:[#allocation5 + $0x38] sm:$0xff] }
  0x12   :  { %172 = vmatpush.msra.mxu2 %v72_v3  ;;  %83 = vmatpush.msra.mxu0 %v72_v3  ;;  %v64_v19 = vld [vmem:[#allocation3 + $0x20] sm:$0xff]  ;;  %v63_v21 = vld [vmem:[#allocation3 + $0x18] sm:$0xff]  ;;  %v113_v22 = vld [vmem:[#allocation5 + $0x30] sm:$0xff] }
  0x13   :  { %187 = vmatpush.msra.mxu3 %v120_v8  ;;  %125 = vmatpush.msra.mxu1 %v120_v8  ;;  %v62_v23 = vld [vmem:[#allocation3 + $0x10] sm:$0xff]  ;;  %v112_v24 = vld [vmem:[#allocation5 + $0x28] sm:$0xff]  ;;  %v111_v26 = vld [vmem:[#allocation5 + $0x20] sm:$0xff] }
  0x14   :  { %173 = vmatpush.msra.mxu2 %v71_v4  ;;  %84 = vmatpush.msra.mxu0 %v71_v4  ;;  %v61_v25 = vld [vmem:[#allocation3 + $0x8] sm:$0xff]  ;;  %v60_v27 = vld [vmem:[#allocation3] sm:$0xff]  ;;  %v110_v30 = vld [vmem:[#allocation5 + $0x18] sm:$0xff] }
  0x15   :  { %188 = vmatpush.msra.mxu3 %v119_v10  ;;  %126 = vmatpush.msra.mxu1 %v119_v10  ;;  %v59_v28 = vld [vmem:[%s317_s0 + $0x8] sm:$0xff]  ;;  %v58_v29 = vld [vmem:[%s317_s0] sm:$0xff]  ;;  %v109_v31 = vld [vmem:[#allocation5 + $0x10] sm:$0xff] }
  0x16   :  { %174 = vmatpush.msra.mxu2 %v70_v7  ;;  %85 = vmatpush.msra.mxu0 %v70_v7  ;;  %v108_v32 = vld [vmem:[#allocation5 + $0x8] sm:$0xff]  ;;  %v107_v33 = vld [vmem:[#allocation5] sm:$0xff] }
  0x17   :  { %189 = vmatpush.msra.mxu3 %v118_v12  ;;  %127 = vmatpush.msra.mxu1 %v118_v12  ;;  %v205_v34 = vld [vmem:[%s319_s2] ss:$0 sm:$0xff] }
  0x18   :  { %175 = vmatpush.msra.mxu2 %v69_v9  ;;  %86 = vmatpush.msra.mxu0 %v69_v9  ;;  %v206_v41 = vld [vmem:[%s321_s4] ss:$0 sm:$0xff] }
  0x19   :  { %190 = vmatpush.msra.mxu3 %v117_v14  ;;  %128 = vmatpush.msra.mxu1 %v117_v14 }
  0x1a   :  { %176 = vmatpush.msra.mxu2 %v68_v11  ;;  %87 = vmatpush.msra.mxu0 %v68_v11 }
  0x1b   :  { %191 = vmatpush.msra.mxu3 %v116_v16  ;;  %129 = vmatpush.msra.mxu1 %v116_v16 }
  0x1c   :  { %177 = vmatpush.msra.mxu2 %v67_v13  ;;  %88 = vmatpush.msra.mxu0 %v67_v13 }
  0x1d   :  { %192 = vmatpush.msra.mxu3 %v115_v18  ;;  %130 = vmatpush.msra.mxu1 %v115_v18 }
  0x1e   :  { %178 = vmatpush.msra.mxu2 %v66_v15  ;;  %89 = vmatpush.msra.mxu0 %v66_v15 }
  0x1f   :  { %193 = vmatpush.msra.mxu3 %v114_v20  ;;  %131 = vmatpush.msra.mxu1 %v114_v20 }
  0x20   :  { %179 = vmatpush.msra.mxu2 %v65_v17  ;;  %90 = vmatpush.msra.mxu0 %v65_v17 }
  0x21   :  { %194 = vmatpush.msra.mxu3 %v113_v22  ;;  %132 = vmatpush.msra.mxu1 %v113_v22 }
  0x22   :  { %180 = vmatpush.msra.mxu2 %v64_v19  ;;  %91 = vmatpush.msra.mxu0 %v64_v19 }
  0x23   :  { %195 = vmatpush.msra.mxu3 %v112_v24  ;;  %133 = vmatpush.msra.mxu1 %v112_v24 }
  0x24   :  { %181 = vmatpush.msra.mxu2 %v63_v21  ;;  %92 = vmatpush.msra.mxu0 %v63_v21 }
  0x25   :  { %196 = vmatpush.msra.mxu3 %v111_v26  ;;  %134 = vmatpush.msra.mxu1 %v111_v26 }
  0x26   :  { %182 = vmatpush.msra.mxu2 %v62_v23  ;;  %93 = vmatpush.msra.mxu0 %v62_v23 }
  0x27   :  { %197 = vmatpush.msra.mxu3 %v110_v30  ;;  %135 = vmatpush.msra.mxu1 %v110_v30 }
  0x28   :  { %183 = vmatpush.msra.mxu2 %v61_v25  ;;  %94 = vmatpush.msra.mxu0 %v61_v25 }
  0x29   :  { %198 = vmatpush.msra.mxu3 %v109_v31  ;;  %136 = vmatpush.msra.mxu1 %v109_v31 }
  0x2a   :  { %184 = vmatpush.msra.mxu2 %v60_v27  ;;  %95 = vmatpush.msra.mxu0 %v60_v27 }
  0x2b   :  { %99 = vmatmul.f32.vlgmr.msra.gmra.mxu2 %v59_v28  ;;  %96 = vmatmul.f32.vlgmr.msra.gmra.mxu0 %v58_v29 }
  0x2c   :  { %199 = vmatpush.msra.mxu3 %v108_v32  ;;  %137 = vmatpush.msra.mxu1 %v108_v32 }
  0x2e   :  { %200 = vmatpush.msra.mxu3 %v107_v33  ;;  %138 = vmatpush.msra.mxu1 %v107_v33 }
  0xa8   :  { %v97_v35 = vpop.f32.mrf.mxu0 }
  0xa9   :  { %v98_v36 = vadd.f32 %v205_v34, %v97_v35 }
  0xab   :  { %v103_v37 = vmax.f32 %v98_v36, 0.0 }
  0xad   :  { %139 = vmatmul.f32.vlgmr.msra.gmra.mxu1 %v103_v37 }
  0xae   :  { %v100_v38 = vpop.f32.mrf.mxu2 }
  0xaf   :  { %v101_v39 = vadd.f32 %v205_v34, %v100_v38 }
  0xb1   :  { %v104_v40 = vmax.f32 %v101_v39, 0.0 }
  0xb3   :  { %142 = vmatmul.f32.vlgmr.msra.gmra.mxu3 %v104_v40 }
 0x12a   :  { %v140_v42 = vpop.f32.mrf.mxu1 }
 0x12b   :  { %v159_v43 = vadd.f32 %v206_v41, %v140_v42 }
 0x12d   :  { %161 = vst [vmem:[%s322_s5] sm:$0xff] %v159_v43 }
 0x136   :  { %v143_v44 = vpop.f32.mrf.mxu3 }
 0x137   :  { %v160_v45 = vadd.f32 %v206_v41, %v143_v44 }
 0x139   :  { %162 = vst [vmem:[%s322_s5 + $0x8] sm:$0xff] %v160_v45 }
 0x13a   :  { %167 = vsyncpa [#allocation4], 1 }
 0x13b   :  { %168 = vsyncpa [#allocation6], 1 }

// kernel: positionwise_ffn.1
= control target key start
LH: loop header
LB: loop body
LE: loop exit
PB: predicated region body
PF: predicated region fallthrough
CT: control target
= control target key end

     0   :  { %10 = vsyncpa [#allocation4], 0  ;;  %s317_s0 = inlined_call_operand.vmem [shape: f32[16,128], index: 0, kind: input, shape index: {}]   ;;  %s318_s1 = inlined_call_operand.hbm [shape: f32[128,128], index: 1, kind: input, shape index: {}]   ;;  %s319_s2 = inlined_call_operand.vmem [shape: f32[1,128], index: 2, kind: input, shape index: {}]   ;;  %s320_s3 = inlined_call_operand.hbm [shape: f32[128,128], index: 3, kind: input, shape index: {}]   ;;  %s321_s4 = inlined_call_operand.vmem [shape: f32[1,128], index: 4, kind: input, shape index: {}]   ;;  %s322_s5 = inlined_call_operand.vmem [shape: f32[16,128], index: 5, kind: output, shape index: {}]  }
   0x1   :  { %s18_s20 = sshll.u32 %s318_s1, 4  ;;  %s19_s20 = int_to_ptr.hbm [resolvable:$true] %s18_s20 }
   0x2   :  { %11 = vsyncpa [#allocation6], 0  ;;  %s259_s21 = smov [#allocation3]   ;;  %s33_s25 = sshll.u32 %s320_s3, 4  ;;  %s34_s25 = int_to_ptr.hbm [resolvable:$true] %s33_s25 }
   0x3   :  { %s20_s22 = sshll.u32 %s259_s21, 4  ;;  %s260_s26 = smov 128   ;;  %s21_s22 = int_to_ptr.vmem [resolvable:$true] %s20_s22 }
   0x4   :  { %s261_s27 = smov 8   ;;  %s262_s28 = smov [#allocation5]  }
   0x5   :  { %26 = dma.hbm_to_vmem [thread:$0]  %s19_s20, 2048, %s21_s22, [#allocation4], %s260_s26, %s260_s26, %s261_s27  }
   0x6   :  { %s35_s29 = sshll.u32 %s262_s28, 4  ;;  %s36_s29 = int_to_ptr.vmem [resolvable:$true] %s35_s29 }
   0x7   :  { %41 = dma.hbm_to_vmem [thread:$0]  %s34_s25, 2048, %s36_s29, [#allocation6], %s260_s26, %s260_s26, %s261_s27  }
   0x8   :  { %255 = dma.done.wait [#allocation4], 2048  }
   0x9   :  { %256 = vsyncadd [#allocation4], 4294965248 }
   0xa   :  { %257 = dma.done.wait [#allocation6], 2048  }
   0xb   :  { %258 = vsyncadd [#allocation6], 4294965248  ;;  %v75_v0 = vld [vmem:[#allocation3 + $0x78] sm:$0xff]  ;;  %v74_v1 = vld [vmem:[#allocation3 + $0x70] sm:$0xff] }
   0xc   :  { %169 = vmatpush.msra.mxu2 %v75_v0  ;;  %80 = vmatpush.msra.mxu0 %v75_v0  ;;  %v73_v2 = vld [vmem:[#allocation3 + $0x68] sm:$0xff]  ;;  %v72_v3 = vld [vmem:[#allocation3 + $0x60] sm:$0xff]  ;;  %v71_v4 = vld [vmem:[#allocation3 + $0x58] sm:$0xff] }
   0xd   :  { %v122_v5 = vld [vmem:[#allocation5 + $0x78] sm:$0xff]  ;;  %v121_v6 = vld [vmem:[#allocation5 + $0x70] sm:$0xff]  ;;  %v120_v8 = vld [vmem:[#allocation5 + $0x68] sm:$0xff] }
   0xe   :  { %170 = vmatpush.msra.mxu2 %v74_v1  ;;  %81 = vmatpush.msra.mxu0 %v74_v1  ;;  %v70_v7 = vld [vmem:[#allocation3 + $0x50] sm:$0xff]  ;;  %v69_v9 = vld [vmem:[#allocation3 + $0x48] sm:$0xff]  ;;  %v119_v10 = vld [vmem:[#allocation5 + $0x60] sm:$0xff] }
   0xf   :  { %185 = vmatpush.msra.mxu3 %v122_v5  ;;  %123 = vmatpush.msra.mxu1 %v122_v5  ;;  %v68_v11 = vld [vmem:[#allocation3 + $0x40] sm:$0xff]  ;;  %v118_v12 = vld [vmem:[#allocation5 + $0x58] sm:$0xff]  ;;  %v117_v14 = vld [vmem:[#allocation5 + $0x50] sm:$0xff] }
  0x10   :  { %171 = vmatpush.msra.mxu2 %v73_v2  ;;  %82 = vmatpush.msra.mxu0 %v73_v2  ;;  %v67_v13 = vld [vmem:[#allocation3 + $0x38] sm:$0xff]  ;;  %v66_v15 = vld [vmem:[#allocation3 + $0x30] sm:$0xff]  ;;  %v116_v16 = vld [vmem:[#allocation5 + $0x48] sm:$0xff] }
  0x11   :  { %186 = vmatpush.msra.mxu3 %v121_v6  ;;  %124 = vmatpush.msra.mxu1 %v121_v6  ;;  %v65_v17 = vld [vmem:[#allocation3 + $0x28] sm:$0xff]  ;;  %v115_v18 = vld [vmem:[#allocation5 + $0x40] sm:$0xff]  ;;  %v114_v20 = vld [vmem:[#allocation5 + $0x38] sm:$0xff] }
  0x12   :  { %172 = vmatpush.msra.mxu2 %v72_v3  ;;  %83 = vmatpush.msra.mxu0 %v72_v3  ;;  %v64_v19 = vld [vmem:[#allocation3 + $0x20] sm:$0xff]  ;;  %v63_v21 = vld [vmem:[#allocation3 + $0x18] sm:$0xff]  ;;  %v113_v22 = vld [vmem:[#allocation5 + $0x30] sm:$0xff] }
  0x13   :  { %187 = vmatpush.msra.mxu3 %v120_v8  ;;  %125 = vmatpush.msra.mxu1 %v120_v8  ;;  %v62_v23 = vld [vmem:[#allocation3 + $0x10] sm:$0xff]  ;;  %v112_v24 = vld [vmem:[#allocation5 + $0x28] sm:$0xff]  ;;  %v111_v26 = vld [vmem:[#allocation5 + $0x20] sm:$0xff] }
  0x14   :  { %173 = vmatpush.msra.mxu2 %v71_v4  ;;  %84 = vmatpush.msra.mxu0 %v71_v4  ;;  %v61_v25 = vld [vmem:[#allocation3 + $0x8] sm:$0xff]  ;;  %v60_v27 = vld [vmem:[#allocation3] sm:$0xff]  ;;  %v110_v30 = vld [vmem:[#allocation5 + $0x18] sm:$0xff] }
  0x15   :  { %188 = vmatpush.msra.mxu3 %v119_v10  ;;  %126 = vmatpush.msra.mxu1 %v119_v10  ;;  %v59_v28 = vld [vmem:[%s317_s0 + $0x8] sm:$0xff]  ;;  %v58_v29 = vld [vmem:[%s317_s0] sm:$0xff]  ;;  %v109_v31 = vld [vmem:[#allocation5 + $0x10] sm:$0xff] }
  0x16   :  { %174 = vmatpush.msra.mxu2 %v70_v7  ;;  %85 = vmatpush.msra.mxu0 %v70_v7  ;;  %v108_v32 = vld [vmem:[#allocation5 + $0x8] sm:$0xff]  ;;  %v107_v33 = vld [vmem:[#allocation5] sm:$0xff] }
  0x17   :  { %189 = vmatpush.msra.mxu3 %v118_v12  ;;  %127 = vmatpush.msra.mxu1 %v118_v12  ;;  %v205_v34 = vld [vmem:[%s319_s2] ss:$0 sm:$0xff] }
  0x18   :  { %175 = vmatpush.msra.mxu2 %v69_v9  ;;  %86 = vmatpush.msra.mxu0 %v69_v9  ;;  %v206_v41 = vld [vmem:[%s321_s4] ss:$0 sm:$0xff] }
  0x19   :  { %190 = vmatpush.msra.mxu3 %v117_v14  ;;  %128 = vmatpush.msra.mxu1 %v117_v14 }
  0x1a   :  { %176 = vmatpush.msra.mxu2 %v68_v11  ;;  %87 = vmatpush.msra.mxu0 %v68_v11 }
  0x1b   :  { %191 = vmatpush.msra.mxu3 %v116_v16  ;;  %129 = vmatpush.msra.mxu1 %v116_v16 }
  0x1c   :  { %177 = vmatpush.msra.mxu2 %v67_v13  ;;  %88 = vmatpush.msra.mxu0 %v67_v13 }
  0x1d   :  { %192 = vmatpush.msra.mxu3 %v115_v18  ;;  %130 = vmatpush.msra.mxu1 %v115_v18 }
  0x1e   :  { %178 = vmatpush.msra.mxu2 %v66_v15  ;;  %89 = vmatpush.msra.mxu0 %v66_v15 }
  0x1f   :  { %193 = vmatpush.msra.mxu3 %v114_v20  ;;  %131 = vmatpush.msra.mxu1 %v114_v20 }
  0x20   :  { %179 = vmatpush.msra.mxu2 %v65_v17  ;;  %90 = vmatpush.msra.mxu0 %v65_v17 }
  0x21   :  { %194 = vmatpush.msra.mxu3 %v113_v22  ;;  %132 = vmatpush.msra.mxu1 %v113_v22 }
  0x22   :  { %180 = vmatpush.msra.mxu2 %v64_v19  ;;  %91 = vmatpush.msra.mxu0 %v64_v19 }
  0x23   :  { %195 = vmatpush.msra.mxu3 %v112_v24  ;;  %133 = vmatpush.msra.mxu1 %v112_v24 }
  0x24   :  { %181 = vmatpush.msra.mxu2 %v63_v21  ;;  %92 = vmatpush.msra.mxu0 %v63_v21 }
  0x25   :  { %196 = vmatpush.msra.mxu3 %v111_v26  ;;  %134 = vmatpush.msra.mxu1 %v111_v26 }
  0x26   :  { %182 = vmatpush.msra.mxu2 %v62_v23  ;;  %93 = vmatpush.msra.mxu0 %v62_v23 }
  0x27   :  { %197 = vmatpush.msra.mxu3 %v110_v30  ;;  %135 = vmatpush.msra.mxu1 %v110_v30 }
  0x28   :  { %183 = vmatpush.msra.mxu2 %v61_v25  ;;  %94 = vmatpush.msra.mxu0 %v61_v25 }
  0x29   :  { %198 = vmatpush.msra.mxu3 %v109_v31  ;;  %136 = vmatpush.msra.mxu1 %v109_v31 }
  0x2a   :  { %184 = vmatpush.msra.mxu2 %v60_v27  ;;  %95 = vmatpush.msra.mxu0 %v60_v27 }
  0x2b   :  { %99 = vmatmul.f32.vlgmr.msra.gmra.mxu2 %v59_v28  ;;  %96 = vmatmul.f32.vlgmr.msra.gmra.mxu0 %v58_v29 }
  0x2c   :  { %199 = vmatpush.msra.mxu3 %v108_v32  ;;  %137 = vmatpush.msra.mxu1 %v108_v32 }
  0x2e   :  { %200 = vmatpush.msra.mxu3 %v107_v33  ;;  %138 = vmatpush.msra.mxu1 %v107_v33 }
  0xa8   :  { %v97_v35 = vpop.f32.mrf.mxu0 }
  0xa9   :  { %v98_v36 = vadd.f32 %v205_v34, %v97_v35 }
  0xab   :  { %v103_v37 = vmax.f32 %v98_v36, 0.0 }
  0xad   :  { %139 = vmatmul.f32.vlgmr.msra.gmra.mxu1 %v103_v37 }
  0xae   :  { %v100_v38 = vpop.f32.mrf.mxu2 }
  0xaf   :  { %v101_v39 = vadd.f32 %v205_v34, %v100_v38 }
  0xb1   :  { %v104_v40 = vmax.f32 %v101_v39, 0.0 }
  0xb3   :  { %142 = vmatmul.f32.vlgmr.msra.gmra.mxu3 %v104_v40 }
 0x12a   :  { %v140_v42 = vpop.f32.mrf.mxu1 }
 0x12b   :  { %v159_v43 = vadd.f32 %v206_v41, %v140_v42 }
 0x12d   :  { %161 = vst [vmem:[%s322_s5] sm:$0xff] %v159_v43 }
 0x136   :  { %v143_v44 = vpop.f32.mrf.mxu3 }
 0x137   :  { %v160_v45 = vadd.f32 %v206_v41, %v143_v44 }
 0x139   :  { %162 = vst [vmem:[%s322_s5 + $0x8] sm:$0xff] %v160_v45 }
 0x13a   :  { %167 = vsyncpa [#allocation4], 1 }
 0x13b   :  { %168 = vsyncpa [#allocation6], 1 }

</bundles_post_ra>
